<compile_context>
chip_gen: v5e
topology: v5e:2x2
jax: 0.10.0
libtpu: 0.0.40
codegen_flags: <defaults>
</compile_context>

<pallas_src>
import jax
import jax.numpy as jnp
from jax.experimental import pallas as pl
from jax.experimental.pallas import tpu as pltpu


def _evl_frame_kernel(x_ref, w_ref, pos_ref, o_ref):
    """Fused depthwise temporal conv1d (k=3, pad=1) + residual + pos-embed.

    x_ref   : (NB, T, C)  NB whole clips
    w_ref   : (3, C)      depthwise taps; centre tap already includes +1 residual
    pos_ref : (T, C)      temporal pos-embed (+ conv bias), broadcast over NB
    o_ref   : (NB, T, C)  frame_features output
    """
    x = x_ref[...]                                   # (NB, T, C)
    nb, t, c = x.shape

    # Per-channel taps as (1, C) slices -> clean sublane/lane broadcast.
    w0 = w_ref[0:1, :]                               # tap for x[t-1]
    w1 = w_ref[1:2, :]                               # centre tap (+1 residual)
    w2 = w_ref[2:3, :]                               # tap for x[t+1]

    # Centre tap + (pos embed + conv bias), broadcast over the NB clips.
    acc = x * w1 + pos_ref[...]

    # T-axis shifted neighbours via slice + zero-plane concat.  The zero plane
    # implements the conv's zero padding at t==0 / t==T-1 directly, so no
    # iota / mod / where boundary masks are needed.  Shifts never cross clip
    # boundaries because the whole T extent lives inside the block.
    zero = jnp.zeros((nb, 1, c), dtype=x.dtype)
    x_m1 = jnp.concatenate([zero, x[:, : t - 1, :]], axis=1)    # x[t-1]
    acc = acc + x_m1 * w0
    x_p1 = jnp.concatenate([x[:, 1:, :], zero], axis=1)         # x[t+1]
    acc = acc + x_p1 * w2

    o_ref[...] = acc.astype(o_ref.dtype)


def _chip_profile():
    """Per-generation tiling knobs: (block_target_bytes, vmem_limit_bytes, two_tc)."""
    kind = ""
    try:
        kind = jax.devices()[0].device_kind.lower()
    except Exception:
        pass
    if "v7" in kind:
        # 64 MiB physical VMEM / TC, 3.2 TB/s HBM, 2 TensorCores.
        return 6 * 1024 * 1024, 48 * 1024 * 1024, True
    if "v6" in kind:
        # 128 MiB physical VMEM, 1.4 TB/s HBM.
        return 4 * 1024 * 1024, 64 * 1024 * 1024, False
    # v5e / older / unknown: stay under the 16 MiB scoped-VMEM default (no flags).
    return 2 * 1024 * 1024, None, False


def _choose_batch_block(n, t, c, itemsize, target_bytes, two_tc):
    """Pick NB = whole clips per block, targeting ~target_bytes per block."""
    clip_bytes = t * c * itemsize
    nb = max(1, int(target_bytes) // int(clip_bytes))
    if two_tc and n > 1:
        # Keep >= 2 grid blocks so both v7x TensorCores get work; on 1-TC parts
        # this constraint would only shrink blocks (pure overhead), so skip it.
        nb = min(nb, (n + 1) // 2)
    return min(nb, n)


def evl_decoder_forward(in_features, conv_weights, conv_biases, pos_embeds,
                        num_layers, video_mask=None):
    """Pallas implementation of EVLDecoder.forward (add_vid_feat=False).

    in_features : (N, T, C)
    conv_weights: list of (3, C)   per-layer depthwise conv taps
                                   (w[k, c] = torch_conv.weight[c, 0, k])
    conv_biases : list of (1, C)   per-layer conv bias
    pos_embeds  : list of (T, C)   per-layer temporal pos embed
    video_mask  : unused when add_vid_feat=False (kept for signature parity)
    """
    del video_mask  # only used by the (disabled) add_vid_feat branch
    N, T, C = in_features.shape
    dtype = in_features.dtype
    itemsize = jnp.dtype(dtype).itemsize

    # Only the LAST layer's parameters reach the output (see header comment).
    w = conv_weights[num_layers - 1].astype(dtype)         # (3, C)
    b = conv_biases[num_layers - 1].astype(dtype)          # (1, C)
    pos = pos_embeds[num_layers - 1].astype(dtype)         # (T, C)

    # Fold the residual into the centre tap and the conv bias into pos.
    w_folded = w.at[1, :].add(jnp.asarray(1.0, dtype=dtype))        # (3, C)
    pos_plus_bias = pos + b                                          # (T, C)

    target_bytes, vmem_limit, two_tc = _chip_profile()
    NB = _choose_batch_block(N, T, C, itemsize, target_bytes, two_tc)
    grid = (pl.cdiv(N, NB),)   # ragged last block OK: blocks are clip-aligned

    cp_kwargs = dict(dimension_semantics=("parallel",))
    if vmem_limit is not None:
        cp_kwargs["vmem_limit_bytes"] = vmem_limit

    out = pl.pallas_call(
        _evl_frame_kernel,
        out_shape=jax.ShapeDtypeStruct((N, T, C), dtype),
        grid=grid,
        in_specs=[
            # (NB, T, C): last two dims equal the full array dims -> always legal.
            pl.BlockSpec((NB, T, C), lambda i: (i, 0, 0)),
            pl.BlockSpec((3, C), lambda i: (0, 0)),     # folded conv taps (tiny)
            pl.BlockSpec((T, C), lambda i: (0, 0)),     # pos embed (+bias), untiled
        ],
        out_specs=pl.BlockSpec((NB, T, C), lambda i: (i, 0, 0)),
        compiler_params=pltpu.CompilerParams(**cp_kwargs),
    )(in_features, w_folded, pos_plus_bias)

    return out


def _reference_forward(in_features, conv_weights, conv_biases, pos_embeds,
                       num_layers):
    """Pure-JAX reference matching the PyTorch module loop exactly."""
    frame_features = in_features
    for i in range(num_layers):
        xp = jnp.pad(in_features, ((0, 0), (1, 1), (0, 0)))
        conv = (xp[:, :-2, :] * conv_weights[i][0][None, None, :]
                + xp[:, 1:-1, :] * conv_weights[i][1][None, None, :]
                + xp[:, 2:, :] * conv_weights[i][2][None, None, :]
                + conv_biases[i][None, :, :])
        frame_features = in_features + conv + pos_embeds[i][None, :, :]
    return frame_features


if __name__ == "__main__":
    # Small, consistent shapes: N=2 clips, T=8 frames, C=128 feature dim.
    N, T, C = 2, 8, 128
    num_layers = 4

    key = jax.random.PRNGKey(0)
    k_x, *k_params = jax.random.split(key, 1 + 3 * num_layers)

    in_features = jax.random.normal(k_x, (N, T, C), dtype=jnp.float32)
    # video_mask exists in the module signature; unused when add_vid_feat=False.
    video_mask = jnp.ones((N, T), dtype=jnp.float32)

    # Deterministic synthetic parameters.
    # torch Conv1d weight is (C, 1, 3); we store it transposed as (3, C).
    conv_weights, conv_biases, pos_embeds = [], [], []
    for i in range(num_layers):
        kw, kb, kp = k_params[3 * i:3 * i + 3]
        conv_weights.append(
            jax.random.normal(kw, (3, C), dtype=jnp.float32) * 0.1)
        conv_biases.append(
            jax.random.normal(kb, (1, C), dtype=jnp.float32) * 0.1)
        # PyTorch inits these to zeros; use small random values so the kernel
        # path is exercised non-trivially.
        pos_embeds.append(
            jax.random.normal(kp, (T, C), dtype=jnp.float32) * 0.02)

    out = evl_decoder_forward(in_features, conv_weights, conv_biases,
                              pos_embeds, num_layers, video_mask)
    out = jax.block_until_ready(out)

    ref = _reference_forward(in_features, conv_weights, conv_biases,
                             pos_embeds, num_layers)
    assert out.shape == (N, T, C)
    assert jnp.allclose(out, ref, atol=1e-5, rtol=1e-5), "mismatch vs reference"

    print("KERNEL_OK")
</pallas_src>

<mosaic_0001>
module attributes {stable_mosaic.version = 11 : i64} {
  func.func @_evl_frame_kernel(%arg0: i32, %arg1: memref<2x8x128xf32, #tpu.memory_space<vmem>>, %arg2: memref<3x128xf32, #tpu.memory_space<vmem>>, %arg3: memref<8x128xf32, #tpu.memory_space<vmem>>, %arg4: memref<2x8x128xf32, #tpu.memory_space<vmem>>) attributes {dimension_semantics = [#tpu.dimension_semantics<parallel>], iteration_bounds = array<i64: 1>, scalar_prefetch = 0 : i64, scratch_operands = 0 : i64, tpu.core_type = #tpu.core_type<tc>, window_params = [{transform_indices = @transform_0, window_bounds = array<i64: 2, 8, 128>}, {pipeline_mode = #tpu.pipeline_mode<synchronous>, transform_indices = @transform_1, window_bounds = array<i64: 3, 128>}, {pipeline_mode = #tpu.pipeline_mode<synchronous>, transform_indices = @transform_2, window_bounds = array<i64: 8, 128>}, {transform_indices = @transform_3, window_bounds = array<i64: 2, 8, 128>}]} {
    %c0 = arith.constant 0 : index
    %c0_0 = arith.constant 0 : index
    %c0_1 = arith.constant 0 : index
    %0 = vector.load %arg1[%c0, %c0_0, %c0_1] : memref<2x8x128xf32, #tpu.memory_space<vmem>>, vector<2x8x128xf32>
    %c0_2 = arith.constant 0 : index
    %c0_3 = arith.constant 0 : index
    %1 = vector.load %arg2[%c0_2, %c0_3] : memref<3x128xf32, #tpu.memory_space<vmem>>, vector<1x128xf32>
    %c1 = arith.constant 1 : index
    %c0_4 = arith.constant 0 : index
    %2 = vector.load %arg2[%c1, %c0_4] : memref<3x128xf32, #tpu.memory_space<vmem>>, vector<1x128xf32>
    %c2 = arith.constant 2 : index
    %c0_5 = arith.constant 0 : index
    %3 = vector.load %arg2[%c2, %c0_5] : memref<3x128xf32, #tpu.memory_space<vmem>>, vector<1x128xf32>
    %4 = vector.shape_cast %2 : vector<1x128xf32> to vector<1x1x128xf32>
    %5 = vector.broadcast %4 : vector<1x1x128xf32> to vector<2x8x128xf32>
    %6 = arith.mulf %0, %5 : vector<2x8x128xf32>
    %c0_6 = arith.constant 0 : index
    %c0_7 = arith.constant 0 : index
    %7 = vector.load %arg3[%c0_6, %c0_7] : memref<8x128xf32, #tpu.memory_space<vmem>>, vector<8x128xf32>
    %8 = vector.shape_cast %7 : vector<8x128xf32> to vector<1x8x128xf32>
    %9 = vector.broadcast %8 : vector<1x8x128xf32> to vector<2x8x128xf32>
    %10 = arith.addf %6, %9 : vector<2x8x128xf32>
    %cst = arith.constant 0.000000e+00 : f32
    %11 = vector.broadcast %cst : f32 to vector<2x1x128xf32>
    %12 = vector.extract_strided_slice %0 {offsets = [0, 0, 0], sizes = [2, 7, 128], strides = [1, 1, 1]} : vector<2x8x128xf32> to vector<2x7x128xf32>
    %13 = tpu.concatenate %11, %12 in 1 : vector<2x1x128xf32>, vector<2x7x128xf32> -> vector<2x8x128xf32>
    %14 = vector.shape_cast %1 : vector<1x128xf32> to vector<1x1x128xf32>
    %15 = vector.broadcast %14 : vector<1x1x128xf32> to vector<2x8x128xf32>
    %16 = arith.mulf %13, %15 : vector<2x8x128xf32>
    %17 = arith.addf %10, %16 : vector<2x8x128xf32>
    %18 = vector.extract_strided_slice %0 {offsets = [0, 1, 0], sizes = [2, 7, 128], strides = [1, 1, 1]} : vector<2x8x128xf32> to vector<2x7x128xf32>
    %19 = tpu.concatenate %18, %11 in 1 : vector<2x7x128xf32>, vector<2x1x128xf32> -> vector<2x8x128xf32>
    %20 = vector.shape_cast %3 : vector<1x128xf32> to vector<1x1x128xf32>
    %21 = vector.broadcast %20 : vector<1x1x128xf32> to vector<2x8x128xf32>
    %22 = arith.mulf %19, %21 : vector<2x8x128xf32>
    %23 = arith.addf %17, %22 : vector<2x8x128xf32>
    %c0_8 = arith.constant 0 : index
    %c0_9 = arith.constant 0 : index
    %c0_10 = arith.constant 0 : index
    %24 = vector.load %arg4[%c0_8, %c0_9, %c0_10] : memref<2x8x128xf32, #tpu.memory_space<vmem>>, vector<2x8x128xf32>
    tpu.vector_store %arg4[%c0_8, %c0_9, %c0_10], %23 {strides = array<i32>} : memref<2x8x128xf32, #tpu.memory_space<vmem>>, vector<2x8x128xf32>,
    return
  }
  func.func @transform_0(%arg0: i32) -> (i32, i32, i32) {
    %c0_i32 = arith.constant 0 : i32
    %c0_i32_0 = arith.constant 0 : i32
    %c0_i32_1 = arith.constant 0 : i32
    return %arg0, %c0_i32, %c0_i32_0 : i32, i32, i32
  }
  func.func @transform_1(%arg0: i32) -> (i32, i32) {
    %c0_i32 = arith.constant 0 : i32
    %c0_i32_0 = arith.constant 0 : i32
    %c0_i32_1 = arith.constant 0 : i32
    return %c0_i32, %c0_i32_0 : i32, i32
  }
  func.func @transform_2(%arg0: i32) -> (i32, i32) {
    %c0_i32 = arith.constant 0 : i32
    %c0_i32_0 = arith.constant 0 : i32
    %c0_i32_1 = arith.constant 0 : i32
    return %c0_i32, %c0_i32_0 : i32, i32
  }
  func.func @transform_3(%arg0: i32) -> (i32, i32, i32) {
    %c0_i32 = arith.constant 0 : i32
    %c0_i32_0 = arith.constant 0 : i32
    %c0_i32_1 = arith.constant 0 : i32
    return %arg0, %c0_i32, %c0_i32_0 : i32, i32, i32
  }
}

</mosaic_0001>

<bundles_post_ra>
// kernel: tpu_custom_call.1
= control target key start
LH: loop header
LB: loop body
LE: loop exit
PB: predicated region body
PF: predicated region fallthrough
CT: control target
= control target key end

     0   :  { %8 = vsyncpa [#allocation3], 0  ;;  %s276_s0 = inlined_call_operand.hbm [shape: f32[2,8,128], index: 0, kind: input, shape index: {}]   ;;  %s277_s1 = inlined_call_operand.hbm [shape: f32[3,128], index: 1, kind: input, shape index: {}]   ;;  %s278_s2 = inlined_call_operand.hbm [shape: f32[8,128], index: 2, kind: input, shape index: {}]   ;;  %s279_s3 = inlined_call_operand.hbm [shape: f32[2,8,128], index: 3, kind: output, shape index: {}]  }
   0x1   :  { %9 = vsyncpa [#allocation6], 0  ;;  %s29_s14 = sshll.u32 %s277_s1, 4  ;;  %s30_s14 = int_to_ptr.hbm [resolvable:$true] %s29_s14 }
   0x2   :  { %10 = vsyncpa [#allocation4], 0  ;;  %s228_s15 = smov [#allocation5]   ;;  %s15_s19 = sshll.u32 %s276_s0, 4  ;;  %s16_s19 = int_to_ptr.hbm [resolvable:$true] %s15_s19 }
   0x3   :  { %s31_s16 = sshll.u32 %s228_s15, 4  ;;  %s229_s20 = smov [#allocation2]   ;;  %s32_s16 = int_to_ptr.vmem [resolvable:$true] %s31_s16 }
   0x4   :  { %34 = dma.hbm_to_vmem [thread:$0]  %s30_s14, 64, %s32_s16, [#allocation6]  }
   0x5   :  { %s17_s21 = sshll.u32 %s229_s20, 4  ;;  %s230_s22 = smov 128   ;;  %s18_s21 = int_to_ptr.vmem [resolvable:$true] %s17_s21 }
   0x6   :  { %s231_s23 = smov 8   ;;  %s40_s25 = sshll.u32 %s278_s2, 4  ;;  %s41_s25 = int_to_ptr.hbm [resolvable:$true] %s40_s25 }
   0x7   :  { %23 = dma.hbm_to_vmem [thread:$0]  %s16_s19, 256, %s18_s21, [#allocation3], %s230_s22, %s230_s22, %s231_s23  }
   0x8   :  { %s232_s26 = smov [#allocation7]  }
   0x9   :  { %s42_s27 = sshll.u32 %s232_s26, 4  ;;  %s43_s27 = int_to_ptr.vmem [resolvable:$true] %s42_s27 }
   0xa   :  { %45 = dma.hbm_to_vmem [thread:$0]  %s41_s25, 128, %s43_s27, [#allocation6]  }
   0xb   :  { %222 = dma.done.wait [#allocation3], 256  }
   0xc   :  { %223 = vsyncadd [#allocation3], 4294967040 }
   0xd   :  { %224 = dma.done.wait [#allocation6], 192  }
   0xe   :  { %225 = vsyncadd [#allocation6], 4294967104  ;;  %vm75_vm0 = vcmask 1040384   ;;  %v58_v0 = vld [vmem:[#allocation2] sm:$0xff]  ;;  %vm87_vm1 = vcmask 1046528   ;;  %v66_v2 = vld [vmem:[#allocation7] sm:$0xff] }
   0xf   :  { %v123_v1 = vld [vmem:[#allocation5 + $0x1] ss:$0 sm:$0xff]  ;;  %v71_v3 = vrot.slane %v58_v0, 7  ;;  %v124_v4 = vld [vmem:[#allocation5] ss:$0 sm:$0xff]  ;;  %v83_v5 = vrot.slane %v58_v0, 1 }
  0x10   :  { %v125_v6 = vld [vmem:[#allocation5 + $0x2] ss:$0 sm:$0xff]  ;;  %v59_v7 = vld [vmem:[#allocation2 + $0x8] sm:$0xff]  ;;  %v64_v8 = vmul.f32 %v123_v1, %v58_v0  ;;  %s233_s0 = smov [#allocation8]   ;;  %s103_s30 = sshll.u32 %s279_s3, 4  ;;  %s104_s30 = int_to_ptr.hbm [resolvable:$true] %s103_s30 }
  0x11   :  { %v76_v9 = vsel %vm75_vm0, 0.0, %v71_v3  ;;  %v65_v10 = vmul.f32 %v123_v1, %v59_v7  ;;  %v72_v11 = vrot.slane %v59_v7, 7  ;;  %v88_v13 = vsel %vm87_vm1, %v83_v5, 0.0  ;;  %s101_s2 = sshll.u32 %s233_s0, 4  ;;  %s102_s2 = int_to_ptr.vmem [resolvable:$true] %s101_s2 }
  0x12   :  { %v79_v12 = vmul.f32 %v124_v4, %v76_v9  ;;  %v84_v14 = vrot.slane %v59_v7, 1  ;;  %v67_v15 = vadd.f32 %v66_v2, %v64_v8  ;;  %v91_v16 = vmul.f32 %v125_v6, %v88_v13 }
  0x13   :  { %v68_v17 = vadd.f32 %v66_v2, %v65_v10  ;;  %v77_v18 = vsel %vm75_vm0, 0.0, %v72_v11 }
  0x14   :  { %v80_v19 = vmul.f32 %v124_v4, %v77_v18  ;;  %v89_v20 = vsel %vm87_vm1, %v84_v14, 0.0  ;;  %v81_v21 = vadd.f32 %v79_v12, %v67_v15 }
  0x15   :  { %v92_v22 = vmul.f32 %v125_v6, %v89_v20 }
  0x16   :  { %v82_v23 = vadd.f32 %v80_v19, %v68_v17  ;;  %v93_v24 = vadd.f32 %v91_v16, %v81_v21 }
  0x18   :  { %v94_v25 = vadd.f32 %v92_v22, %v82_v23  ;;  %95 = vst [vmem:[#allocation8] sm:$0xff] %v93_v24 }
  0x1a   :  { %96 = vst [vmem:[#allocation8 + $0x8] sm:$0xff] %v94_v25 }
  0x1b   :  { %109 = dma.vmem_to_hbm [thread:$0]  %s102_s2, 256, %s104_s30, [#allocation4], %s230_s22, %s230_s22, %s231_s23  }
  0x1c   :  { %226 = dma.done.wait [#allocation4], 256  }
  0x1d   :  { %227 = vsyncadd [#allocation4], 4294967040 }
  0x1e   :  { %114 = vsyncpa [#allocation3], 1 }
  0x1f   :  { %115 = vsyncpa [#allocation6], 1 }
  0x20   :  { %116 = vsyncpa [#allocation4], 1 }

</bundles_post_ra>
